<compile_context>
chip_gen: v5e
topology: v5e:2x2
jax: 0.10.0
libtpu: 0.0.40
codegen_flags: <defaults>
</compile_context>

<pallas_src>
import jax
import jax.numpy as jnp
from jax.experimental import pallas as pl
from jax.experimental.pallas import tpu as pltpu


def _rowscale_kernel(s_ref, x_ref, o_ref):
    # s_ref: (tr, 1) per-row scale;  x_ref / o_ref: (tr, tc)
    o_ref[...] = (x_ref[...] * s_ref[...]).astype(o_ref.dtype)


def _uniform_scale_kernel(s_ref, x_ref, o_ref):
    # s_ref: (1,) scalar in SMEM;  x_ref / o_ref: (tr, tc)
    o_ref[...] = (x_ref[...] * s_ref[0]).astype(o_ref.dtype)


def _round_up(a: int, b: int) -> int:
    return ((a + b - 1) // b) * b


def _vmem_budget():
    """Generation-aware (max_tile_bytes, vmem_limit_cap)."""
    vmem_bytes = 64 << 20                        # conservative v7x fallback
    try:
        info = pltpu.get_tpu_info()
        vmem_bytes = int(getattr(info, "vmem_capacity_bytes", vmem_bytes))
    except Exception:
        pass
    if vmem_bytes >= (100 << 20):                # v5e / v6e: 128 MiB VMEM
        return 8 << 20, 96 << 20
    return 4 << 20, 44 << 20                     # v7x: 64 MiB VMEM


def _choose_tiles(rows, cols, in_itemsize, out_itemsize, max_tile_bytes):
    """Balanced lane-dense tiles; arrays are never padded (partial edge blocks
    are safe here: elementwise op, OOB reads discarded, OOB writes masked)."""
    sub = max(8, 32 // in_itemsize)              # sublane multiple per dtype
    lane = 128
    bpe = max(in_itemsize, out_itemsize)

    rows_full = _round_up(rows, sub)

    # Column tile: full dim when narrow; otherwise balanced multiples of 128,
    # allowed to grow past 2048 lanes when there are only a few rows so the
    # x tile still reaches the multi-MiB range.
    if cols <= lane:
        tc = cols                                # full-dim block (valid layout)
    else:
        tc_budget = (max_tile_bytes // (rows_full * bpe) // lane) * lane
        tc_cap = max(2048, tc_budget)
        cols_p = _round_up(cols, lane)
        n_c = pl.cdiv(cols_p, tc_cap)
        tc = min(cols_p, _round_up(pl.cdiv(cols_p, n_c), lane))

    # Row tile: fill the byte budget, balanced over the row extent.
    if rows <= sub:
        tr = rows                                # full-dim block (valid layout)
    else:
        per_row_bytes = _round_up(tc, lane) * bpe
        tr_max = max(sub, (max_tile_bytes // per_row_bytes // sub) * sub)
        n_r = pl.cdiv(rows_full, tr_max)
        tr = min(rows_full, _round_up(pl.cdiv(rows_full, n_r), sub))

    # Make sure v7x's two TensorCores both get work on non-trivial inputs.
    total_bytes = rows * cols * in_itemsize
    if pl.cdiv(rows, tr) * pl.cdiv(cols, tc) < 2 and total_bytes >= (2 << 20):
        if tr >= 2 * sub:
            tr = _round_up(pl.cdiv(tr, 2), sub)
        elif tc >= 2 * lane:
            tc = _round_up(pl.cdiv(tc, 2), lane)

    # VMEM footprint of one (tr, tc) tile, including sublane/lane padding.
    tile_bytes = _round_up(max(tr, 1), sub) * _round_up(max(tc, 1), lane) * bpe
    return tr, tc, tile_bytes


def _compiler_params(tile_bytes, vmem_cap):
    vmem_limit = int(min(vmem_cap, max(32 << 20, 6 * tile_bytes + (4 << 20))))
    return pltpu.CompilerParams(
        dimension_semantics=("parallel", "parallel"),
        vmem_limit_bytes=vmem_limit)


def transpose_forward(scalar: jax.Array, x: jax.Array) -> jax.Array:
    """Pallas equivalent of TransposeLinearSystem(Scalar(scalar)).forward(x).

    scalar: array whose shape is a broadcastable prefix of x.shape
            (e.g. (), (B,), (B, C)).   x: (B, C, H, W).
    """
    scalar = jnp.asarray(scalar)
    x = jnp.asarray(x)

    # Mirror the PyTorch-side shape assertion (prefix / broadcastable).
    for i, s in enumerate(scalar.shape):
        assert x.shape[i] == s or s == 1, \
            "The input tensor shape does not match the scalar shape."

    B, C, H, W = x.shape
    rows, cols = B * C, H * W
    out_dtype = jnp.result_type(scalar.dtype, x.dtype)   # torch-style promotion
    in_itemsize = jnp.dtype(x.dtype).itemsize
    out_itemsize = jnp.dtype(out_dtype).itemsize
    s_dtype = (jnp.float32 if jnp.issubdtype(out_dtype, jnp.floating)
               else out_dtype)

    max_tile_bytes, vmem_cap = _vmem_budget()

    if scalar.ndim == 0:
        # 0-d scalar through SMEM: per-row structure irrelevant, so reshape x
        # (free, metadata-only) into the most lane-dense slab we can factor.
        total = rows * cols
        r2, c2 = rows, cols
        for k in range(4096 // 128, 0, -1):
            if total % (128 * k) == 0:
                r2, c2 = total // (128 * k), 128 * k
                break
        tr, tc, tile_bytes = _choose_tiles(r2, c2, in_itemsize, out_itemsize,
                                           max_tile_bytes)
        grid = (pl.cdiv(r2, tr), pl.cdiv(c2, tc))
        out2d = pl.pallas_call(
            _uniform_scale_kernel,
            out_shape=jax.ShapeDtypeStruct((r2, c2), out_dtype),
            grid_spec=pltpu.PrefetchScalarGridSpec(
                num_scalar_prefetch=0,
                grid=grid,
                in_specs=[
                    pl.BlockSpec(memory_space=pltpu.MemorySpace.SMEM),
                    pl.BlockSpec((tr, tc), lambda i, j: (i, j)),
                ],
                out_specs=pl.BlockSpec((tr, tc), lambda i, j: (i, j))),
            compiler_params=_compiler_params(tile_bytes, vmem_cap),
        )(scalar.astype(s_dtype).reshape(1), x.reshape(r2, c2))
        return out2d.reshape(B, C, H, W)

    # Per-(batch, channel) scalar folded onto the (B*C) row axis: O(B*C) glue,
    # no full-size broadcast ever materialized.
    if scalar.ndim > 2:
        assert all(s == 1 for s in scalar.shape[2:]), \
            "per-spatial scalar shapes not supported"  # TODO(synk): general per-element scalars
        scalar = scalar.reshape(scalar.shape[:2])
    s2 = scalar.reshape(scalar.shape + (1,) * (2 - scalar.ndim))
    s_rows = jnp.broadcast_to(s2.astype(s_dtype), (B, C)).reshape(rows, 1)

    tr, tc, tile_bytes = _choose_tiles(rows, cols, in_itemsize, out_itemsize,
                                       max_tile_bytes)
    grid = (pl.cdiv(rows, tr), pl.cdiv(cols, tc))
    out2d = pl.pallas_call(
        _rowscale_kernel,
        out_shape=jax.ShapeDtypeStruct((rows, cols), out_dtype),
        grid_spec=pltpu.PrefetchScalarGridSpec(
            num_scalar_prefetch=0,
            grid=grid,
            in_specs=[
                pl.BlockSpec((tr, 1), lambda i, j: (i, 0)),   # per-row scale
                pl.BlockSpec((tr, tc), lambda i, j: (i, j)),  # x tile
            ],
            out_specs=pl.BlockSpec((tr, tc), lambda i, j: (i, j))),
        compiler_params=_compiler_params(tile_bytes, vmem_cap),
    )(s_rows, x.reshape(rows, cols))
    return out2d.reshape(B, C, H, W)


if __name__ == "__main__":
    key = jax.random.PRNGKey(0)
    kx, ks = jax.random.split(key)

    B, C, H, W = 2, 4, 16, 16
    x = jax.random.normal(kx, (B, C, H, W), dtype=jnp.float32)

    # Per-(batch, channel) scalar tensor (prefix of x.shape).
    scalar = jnp.arange(B * C, dtype=jnp.float32).reshape(B, C) * 0.25 + 0.5

    out = transpose_forward(scalar, x)
    jax.block_until_ready(out)
    ref = scalar.reshape(B, C, 1, 1) * x
    assert out.shape == x.shape and out.dtype == x.dtype
    assert jnp.allclose(out, ref, atol=1e-6), "mismatch vs reference"

    # 0-d scalar case (float passed to the module __init__) — SMEM path.
    out0 = transpose_forward(jnp.asarray(3.0, dtype=jnp.float32), x)
    jax.block_until_ready(out0)
    assert jnp.allclose(out0, 3.0 * x, atol=1e-6)

    # Non-(8,128)-divisible shape exercises the partial-edge-block path.
    x2 = jax.random.normal(ks, (2, 3, 10, 10), dtype=jnp.float32)
    s2 = jnp.arange(2, dtype=jnp.float32) + 1.0          # shape (B,)
    out2 = transpose_forward(s2, x2)
    jax.block_until_ready(out2)
    assert jnp.allclose(out2, s2.reshape(2, 1, 1, 1) * x2, atol=1e-6)

    print("KERNEL_OK")
</pallas_src>

<mosaic_0001>
module attributes {stable_mosaic.version = 11 : i64} {
  func.func @_rowscale_kernel(%arg0: i32, %arg1: i32, %arg2: memref<8x1xf32, #tpu.memory_space<vmem>>, %arg3: memref<8x256xf32, #tpu.memory_space<vmem>>, %arg4: memref<8x256xf32, #tpu.memory_space<vmem>>) attributes {dimension_semantics = [#tpu.dimension_semantics<parallel>, #tpu.dimension_semantics<parallel>], iteration_bounds = array<i64: 1, 1>, scalar_prefetch = 0 : i64, scratch_operands = 0 : i64, tpu.core_type = #tpu.core_type<tc>, window_params = [{transform_indices = @transform_0, window_bounds = array<i64: 8, 1>}, {transform_indices = @transform_1, window_bounds = array<i64: 8, 256>}, {transform_indices = @transform_2, window_bounds = array<i64: 8, 256>}]} {
    %c0 = arith.constant 0 : index
    %c0_0 = arith.constant 0 : index
    %0 = vector.load %arg3[%c0, %c0_0] : memref<8x256xf32, #tpu.memory_space<vmem>>, vector<8x256xf32>
    %c0_1 = arith.constant 0 : index
    %c0_2 = arith.constant 0 : index
    %1 = vector.load %arg2[%c0_1, %c0_2] : memref<8x1xf32, #tpu.memory_space<vmem>>, vector<8x1xf32>
    %2 = vector.broadcast %1 : vector<8x1xf32> to vector<8x256xf32>
    %3 = arith.mulf %0, %2 : vector<8x256xf32>
    %c0_3 = arith.constant 0 : index
    %c0_4 = arith.constant 0 : index
    %4 = vector.load %arg4[%c0_3, %c0_4] : memref<8x256xf32, #tpu.memory_space<vmem>>, vector<8x256xf32>
    tpu.vector_store %arg4[%c0_3, %c0_4], %3 {strides = array<i32>} : memref<8x256xf32, #tpu.memory_space<vmem>>, vector<8x256xf32>,
    return
  }
  func.func @transform_0(%arg0: i32, %arg1: i32) -> (i32, i32) {
    %c0_i32 = arith.constant 0 : i32
    %c0_i32_0 = arith.constant 0 : i32
    return %arg0, %c0_i32 : i32, i32
  }
  func.func @transform_1(%arg0: i32, %arg1: i32) -> (i32, i32) {
    %c0_i32 = arith.constant 0 : i32
    return %arg0, %arg1 : i32, i32
  }
  func.func @transform_2(%arg0: i32, %arg1: i32) -> (i32, i32) {
    %c0_i32 = arith.constant 0 : i32
    return %arg0, %arg1 : i32, i32
  }
}

</mosaic_0001>

<bundles_post_ra>
// kernel: tpu_custom_call.1
= control target key start
LH: loop header
LB: loop body
LE: loop exit
PB: predicated region body
PF: predicated region fallthrough
CT: control target
= control target key end

     0   :  { %7 = vsyncpa [#allocation3], 0  ;;  %s138_s0 = inlined_call_operand.vmem [shape: f32[8,1], index: 0, kind: input, shape index: {}]   ;;  %s139_s1 = inlined_call_operand.hbm [shape: f32[8,256], index: 1, kind: input, shape index: {}]   ;;  %s140_s2 = inlined_call_operand.hbm [shape: f32[8,256], index: 2, kind: output, shape index: {}]  }
   0x1   :  { %8 = vsyncpa [#allocation4], 0  ;;  %s16_s11 = sshll.u32 %s139_s1, 4  ;;  %s111_s12 = smov [#allocation2]   ;;  %s17_s11 = int_to_ptr.hbm [resolvable:$true] %s16_s11 }
   0x2   :  { %s18_s13 = sshll.u32 %s111_s12, 4  ;;  %s19_s13 = int_to_ptr.vmem [resolvable:$true] %s18_s13 }
   0x3   :  { %21 = dma.hbm_to_vmem [thread:$0]  %s17_s11, 256, %s19_s13, [#allocation3]  }
   0x4   :  { %107 = dma.done.wait [#allocation3], 256  }
   0x5   :  { %108 = vsyncadd [#allocation3], 4294967040  ;;  %v112_v0 = vmov 0   ;;  %v28_v1 = vld [vmem:[%s138_s0] sm:$0xff]  ;;  %v27_v3 = vld [vmem:[#allocation2 + $0x8] sm:$0xff]  ;;  %s113_s16 = smov [#allocation5]  }
   0x6   :  { %58 = vset.pattern.permute.xlu0 %v112_v0  ;;  %v26_v2 = vld [vmem:[#allocation2] sm:$0xff]  ;;  %s43_s17 = sshll.u32 %s113_s16, 4  ;;  %s45_s19 = sshll.u32 %s140_s2, 4  ;;  %s44_s17 = int_to_ptr.vmem [resolvable:$true] %s43_s17  ;;  %s46_s19 = int_to_ptr.hbm [resolvable:$true] %s45_s19 }
   0x7   :  { %31 = vperm.xlu0 %58, %v28_v1  }
  0x79   :  { %v32_v4 = vpop.permute.xlu0 %31 }
  0x7a   :  { %v34_v5 = vmul.f32 %v32_v4, %v26_v2  ;;  %v35_v6 = vmul.f32 %v32_v4, %v27_v3 }
  0x7c   :  { %36 = vst [vmem:[#allocation5] sm:$0xff] %v34_v5 }
  0x7d   :  { %37 = vst [vmem:[#allocation5 + $0x8] sm:$0xff] %v35_v6 }
  0x7e   :  { %48 = dma.vmem_to_hbm [thread:$0]  %s44_s17, 256, %s46_s19, [#allocation4]  }
  0x7f   :  { %109 = dma.done.wait [#allocation4], 256  }
  0x80   :  { %110 = vsyncadd [#allocation4], 4294967040 }
  0x81   :  { %53 = vsyncpa [#allocation3], 1 }
  0x82   :  { %54 = vsyncpa [#allocation4], 1 }

</bundles_post_ra>
